<compile_context>
chip_gen: v6e
topology: v6e:2x2x1
jax: 0.10.0
libtpu: 0.0.40
codegen_flags: <defaults>
</compile_context>

<pallas_src>
import jax
import jax.numpy as jnp
from jax.experimental import pallas as pl
from jax.experimental.pallas import tpu as pltpu

_LANE = 128
_SUBLANE = 8
_BF16_SUBLANE = 16         # bf16 packs 2 rows/sublane; keep batch tiles 16-aligned
_NEG_BIG = -1e30           # padded softmax lanes -> exp underflows to exactly 0


def _round_up(x: int, m: int) -> int:
    return (x + m - 1) // m * m


def _cdiv(a: int, b: int) -> int:
    return -(-a // b)


def _tpu_info():
    """(vmem_capacity_bytes, native MXU tile) with safe fallbacks."""
    vmem = 64 * 2**20                      # conservative default (v7x per-TC VMEM)
    try:
        vmem = int(pltpu.get_tpu_info().vmem_capacity_bytes)
    except Exception:
        pass
    kind = ""
    try:
        kind = jax.devices()[0].device_kind.lower()
    except Exception:
        pass
    mxu = 256 if ("v6" in kind or "v7" in kind) else 128   # 2x256 MXU on v6e/v7x, 128 on v5e
    return vmem, mxu


def _pad_dim(d: int, mxu_tile: int) -> int:
    """Lane-pad a feature dim; snap to the 256-wide MXU on v6e/v7x once it exceeds 128."""
    p = _round_up(max(d, 1), _LANE)
    if mxu_tile > _LANE and p > _LANE:
        p = _round_up(d, mxu_tile)
    return p


# --------------------------------------------------------------------------- #
# Kernel
# --------------------------------------------------------------------------- #
def _policy_kernel(x_ref, w1_ref, b1_ref, w2_ref, b2_ref, o_ref):
    # Hoist bias loads once (JAX does not CSE broadcast_in_dim).
    b1 = b1_ref[...]            # [1, h_pad]  f32 (zeros in padded lanes)
    b2 = b2_ref[...]            # [1, n_pad]  f32 (-1e30 in padded lanes)

    # fc1 + ReLU: in-kernel bf16 cast of x (VPU work hidden under DMA/MXU slack),
    # bf16 MXU operands with f32 accumulation, f32 elementwise.
    x = x_ref[...].astype(jnp.bfloat16)
    h = jnp.dot(x, w1_ref[...], preferred_element_type=jnp.float32) + b1
    h = jnp.maximum(h, 0.0)

    # fc2 logits (lane-dense: h_pad and n_pad are multiples of 128/256).
    logits = jnp.dot(h.astype(jnp.bfloat16), w2_ref[...],
                     preferred_element_type=jnp.float32) + b2

    # Numerically stable softmax; padded lanes carry -1e30 so exp() == 0 there and
    # they perturb neither the max nor the denominator.  Exact division: these
    # probabilities feed log-prob / sampling in a policy-gradient loss.
    m = jnp.max(logits, axis=-1, keepdims=True)
    e = jnp.exp(logits - m)
    denom = jnp.sum(e, axis=-1, keepdims=True)
    o_ref[...] = (e / denom).astype(o_ref.dtype)


# --------------------------------------------------------------------------- #
# Parameter preparation (call once, not per forward)
# --------------------------------------------------------------------------- #
def prepare_policy_params(w1, b1, w2, b2):
    """Pad + cast the parameters once (at init / after each optimizer step).

    w1: [input_dim, hidden_dim], b1: [hidden_dim]-like
    w2: [hidden_dim, output_dim], b2: [output_dim]-like
    (weights stored transposed w.r.t. PyTorch nn.Linear's [out, in] layout).

    Padding is exact: zero-padded hidden units pass 0 through ReLU and hit zero
    w2 rows (contribute nothing); padded OUTPUT lanes get a -1e30 bias so the
    softmax exp is exactly 0 there.
    """
    input_dim, hidden_dim = w1.shape
    output_dim = w2.shape[1]
    _, mxu = _tpu_info()
    h_pad = _pad_dim(hidden_dim, mxu)
    n_pad = _pad_dim(output_dim, mxu)

    w1_p = jnp.zeros((input_dim, h_pad), jnp.bfloat16)
    w1_p = w1_p.at[:, :hidden_dim].set(w1.astype(jnp.bfloat16))
    b1_p = jnp.zeros((1, h_pad), jnp.float32)
    b1_p = b1_p.at[:, :hidden_dim].set(b1.reshape(1, hidden_dim).astype(jnp.float32))
    w2_p = jnp.zeros((h_pad, n_pad), jnp.bfloat16)
    w2_p = w2_p.at[:hidden_dim, :output_dim].set(w2.astype(jnp.bfloat16))
    b2_p = jnp.full((1, n_pad), _NEG_BIG, jnp.float32)
    b2_p = b2_p.at[:, :output_dim].set(b2.reshape(1, output_dim).astype(jnp.float32))

    return {"w1": w1_p, "b1": b1_p, "w2": w2_p, "b2": b2_p,
            "input_dim": input_dim, "hidden_dim": hidden_dim, "output_dim": output_dim}


# --------------------------------------------------------------------------- #
# Forward wrapper
# --------------------------------------------------------------------------- #
def policy_network_forward(x, params):
    """x: [B, input_dim] float -> probs: [B, output_dim] f32 (softmax over last dim)."""
    w1_p, b1_p, w2_p, b2_p = params["w1"], params["b1"], params["w2"], params["b2"]
    output_dim = params["output_dim"]
    B, input_dim = x.shape
    assert input_dim == w1_p.shape[0], "x feature dim does not match prepared params"
    h_pad = w1_p.shape[1]
    n_pad = w2_p.shape[1]

    vmem_cap, _ = _tpu_info()
    vmem_budget = int(0.8 * vmem_cap)          # leave headroom per generation

    # Weights/biases stay VMEM-resident for the whole grid.
    weight_bytes = (w1_p.size + w2_p.size) * 2 + (b1_p.size + b2_p.size) * 4
    if 2 * weight_bytes > vmem_budget:
        # TODO(synk): reduction-tiled (K/H-split) path with an f32 accumulator scratch.
        raise NotImplementedError(
            "policy weights do not fit in VMEM; K-tiled fallback not implemented")

    # ---- batch tiling ----------------------------------------------------
    # Per-row VMEM bytes: double-buffered x/out tiles + live intermediates.
    per_row = (2 * input_dim * 4          # x tile (f32, double-buffered)
               + 2 * n_pad * 4            # out tile (f32, double-buffered)
               + input_dim * 2            # in-kernel bf16 cast of x
               + h_pad * (4 + 2)          # h (f32) + bf16 recast
               + 2 * n_pad * 4)           # logits + exp
    avail = max(vmem_budget - 2 * weight_bytes, per_row * _BF16_SUBLANE)
    cap_tile = 2048 if vmem_cap > 96 * 2**20 else 1024     # bigger tiles on 128 MiB parts
    max_tile = max(_BF16_SUBLANE,
                   min(cap_tile, (avail // per_row) // _BF16_SUBLANE * _BF16_SUBLANE))

    num_tiles = _cdiv(B, max_tile)
    if num_tiles == 1 and B >= 64:
        num_tiles = 2                      # keep both v7x TensorCores busy
    if num_tiles > 1 and num_tiles % 2 == 1:
        num_tiles += 1                     # even tile count -> balanced megacore tail
    tile_b = max(_BF16_SUBLANE, _round_up(_cdiv(B, num_tiles), _BF16_SUBLANE))
    num_tiles = _cdiv(B, tile_b)
    b_pad = num_tiles * tile_b

    # Only touch x when the batch is ragged w.r.t. the tile; zero rows are harmless
    # (bias-only softmax rows, no NaNs) and are sliced off below.
    x_in = x if b_pad == B else jnp.zeros((b_pad, input_dim), x.dtype).at[:B].set(x)

    # ---- VMEM limit / advisory cost -------------------------------------
    est_usage = 2 * weight_bytes + per_row * tile_b + (1 << 20)
    vmem_limit = int(min(vmem_budget, max(2 * est_usage, 32 * 2**20)))

    flops = 2 * b_pad * (input_dim * h_pad + h_pad * n_pad)
    bytes_accessed = b_pad * input_dim * 4 + weight_bytes + b_pad * n_pad * 4
    cost = pl.CostEstimate(flops=flops, transcendentals=b_pad * n_pad,
                           bytes_accessed=bytes_accessed)

    def run(single_buffer_weights: bool):
        if single_buffer_weights:
            def inv_spec(shape):
                # Grid-invariant operand: one VMEM copy is enough (no double-buffering).
                return pl.BlockSpec(shape, lambda i: (0, 0),
                                    pipeline_mode=pl.Buffered(1))
        else:
            def inv_spec(shape):
                return pl.BlockSpec(shape, lambda i: (0, 0))
        return pl.pallas_call(
            _policy_kernel,
            out_shape=jax.ShapeDtypeStruct((b_pad, n_pad), jnp.float32),
            grid=(num_tiles,),
            in_specs=[
                pl.BlockSpec((tile_b, input_dim), lambda i: (i, 0)),   # x: streamed per tile
                inv_spec((input_dim, h_pad)),                          # w1 (bf16, resident)
                inv_spec((1, h_pad)),                                  # b1 (f32)
                inv_spec((h_pad, n_pad)),                              # w2 (bf16, resident)
                inv_spec((1, n_pad)),                                  # b2 (f32, -1e30 pads)
            ],
            out_specs=pl.BlockSpec((tile_b, n_pad), lambda i: (i, 0)),
            compiler_params=pltpu.CompilerParams(
                dimension_semantics=("parallel",),   # shard batch tiles across TCs (v7x)
                vmem_limit_bytes=vmem_limit),
            cost_estimate=cost,
        )(x_in, w1_p, b1_p, w2_p, b2_p)

    try:
        out = run(True)
    except Exception:
        # Fallback if this Pallas version rejects single-buffering; only costs VMEM.
        out = run(False)

    # Drop padded batch rows and padded output lanes (exactly 0).
    return out[:B, :output_dim]


# --------------------------------------------------------------------------- #
# Init + references
# --------------------------------------------------------------------------- #
def init_params(key, input_dim, hidden_dim, output_dim):
    """Init mimicking nn.Linear's default uniform(-1/sqrt(fan_in), 1/sqrt(fan_in))."""
    k1, k2, k3, k4 = jax.random.split(key, 4)
    bound1 = 1.0 / jnp.sqrt(input_dim)
    bound2 = 1.0 / jnp.sqrt(hidden_dim)
    # Stored already transposed relative to PyTorch ([in, out] instead of [out, in]).
    w1 = jax.random.uniform(k1, (input_dim, hidden_dim), jnp.float32, -bound1, bound1)
    b1 = jax.random.uniform(k2, (1, hidden_dim), jnp.float32, -bound1, bound1)
    w2 = jax.random.uniform(k3, (hidden_dim, output_dim), jnp.float32, -bound2, bound2)
    b2 = jax.random.uniform(k4, (1, output_dim), jnp.float32, -bound2, bound2)
    return w1, b1, w2, b2


def reference_forward_f32(x, w1, b1, w2, b2):
    h = jnp.maximum(x @ w1 + b1, 0.0)
    return jax.nn.softmax(h @ w2 + b2, axis=-1)


def reference_forward_bf16(x, w1, b1, w2, b2):
    """Reference matching the kernel's mixed precision (bf16 MXU operands, f32 accum)."""
    xb, w1b, w2b = (a.astype(jnp.bfloat16) for a in (x, w1, w2))
    h = jnp.maximum(jnp.dot(xb, w1b, preferred_element_type=jnp.float32) + b1, 0.0)
    logits = jnp.dot(h.astype(jnp.bfloat16), w2b, preferred_element_type=jnp.float32) + b2
    return jax.nn.softmax(logits, axis=-1)


if __name__ == "__main__":
    input_dim, hidden_dim, output_dim = 16, 32, 8
    batch = 2

    key = jax.random.PRNGKey(0)
    kx, kp = jax.random.split(key)
    x = jax.random.normal(kx, (batch, input_dim), jnp.float32)
    w1, b1, w2, b2 = init_params(kp, input_dim, hidden_dim, output_dim)

    # Prepare (pad + bf16-cast) the parameters once, outside the per-step forward.
    params = prepare_policy_params(w1, b1, w2, b2)

    out = policy_network_forward(x, params)
    out = jax.block_until_ready(out)

    assert out.shape == (batch, output_dim)

    # Precision-matched reference (bf16 matmuls, f32 accumulation).
    ref_bf16 = reference_forward_bf16(x, w1, b1, w2, b2)
    assert jnp.allclose(out, ref_bf16, atol=2e-3, rtol=2e-3)

    # Sanity vs full-f32 reference (looser, bf16 operand rounding).
    ref_f32 = reference_forward_f32(x, w1, b1, w2, b2)
    assert jnp.allclose(out, ref_f32, atol=5e-2, rtol=5e-2)

    # Exact softmax division -> rows sum to 1 to f32 precision.
    assert jnp.allclose(jnp.sum(out, axis=-1), 1.0, atol=1e-5)

    print("KERNEL_OK")
</pallas_src>

<mosaic_0001>
module attributes {stable_mosaic.version = 11 : i64} {
  func.func @_policy_kernel(%arg0: i32, %arg1: memref<16x16xf32, #tpu.memory_space<vmem>>, %arg2: memref<16x128xbf16, #tpu.memory_space<vmem>>, %arg3: memref<1x128xf32, #tpu.memory_space<vmem>>, %arg4: memref<128x128xbf16, #tpu.memory_space<vmem>>, %arg5: memref<1x128xf32, #tpu.memory_space<vmem>>, %arg6: memref<16x128xf32, #tpu.memory_space<vmem>>) attributes {dimension_semantics = [#tpu.dimension_semantics<parallel>], iteration_bounds = array<i64: 1>, scalar_prefetch = 0 : i64, scratch_operands = 0 : i64, tpu.core_type = #tpu.core_type<tc>, window_params = [{transform_indices = @transform_0, window_bounds = array<i64: 16, 16>}, {pipeline_mode = #tpu.pipeline_mode<synchronous>, transform_indices = @transform_1, window_bounds = array<i64: 16, 128>}, {pipeline_mode = #tpu.pipeline_mode<synchronous>, transform_indices = @transform_2, window_bounds = array<i64: 1, 128>}, {pipeline_mode = #tpu.pipeline_mode<synchronous>, transform_indices = @transform_3, window_bounds = array<i64: 128, 128>}, {pipeline_mode = #tpu.pipeline_mode<synchronous>, transform_indices = @transform_4, window_bounds = array<i64: 1, 128>}, {transform_indices = @transform_5, window_bounds = array<i64: 16, 128>}]} {
    %c0 = arith.constant 0 : index
    %c0_0 = arith.constant 0 : index
    %0 = vector.load %arg3[%c0, %c0_0] : memref<1x128xf32, #tpu.memory_space<vmem>>, vector<1x128xf32>
    %c0_1 = arith.constant 0 : index
    %c0_2 = arith.constant 0 : index
    %1 = vector.load %arg5[%c0_1, %c0_2] : memref<1x128xf32, #tpu.memory_space<vmem>>, vector<1x128xf32>
    %c0_3 = arith.constant 0 : index
    %c0_4 = arith.constant 0 : index
    %2 = vector.load %arg1[%c0_3, %c0_4] : memref<16x16xf32, #tpu.memory_space<vmem>>, vector<16x16xf32>
    %3 = arith.truncf %2 : vector<16x16xf32> to vector<16x16xbf16>
    %c0_5 = arith.constant 0 : index
    %c0_6 = arith.constant 0 : index
    %4 = vector.load %arg2[%c0_5, %c0_6] : memref<16x128xbf16, #tpu.memory_space<vmem>>, vector<16x128xbf16>
    %cst = arith.constant dense<0.000000e+00> : vector<16x128xf32>
    %5 = tpu.matmul %3, %4, %cst {dimension_numbers = #tpu.dot_dimension_numbers<[1], [0], [0], [1], [0, 0, 1, 1], [], []>} : vector<16x16xbf16>, vector<16x128xbf16>, vector<16x128xf32> -> vector<16x128xf32>
    %6 = vector.broadcast %0 : vector<1x128xf32> to vector<16x128xf32>
    %7 = arith.addf %5, %6 : vector<16x128xf32>
    %cst_7 = arith.constant 0.000000e+00 : f32
    %8 = vector.broadcast %cst_7 : f32 to vector<16x128xf32>
    %9 = arith.maximumf %7, %8 : vector<16x128xf32>
    %10 = arith.truncf %9 : vector<16x128xf32> to vector<16x128xbf16>
    %c0_8 = arith.constant 0 : index
    %c0_9 = arith.constant 0 : index
    %11 = vector.load %arg4[%c0_8, %c0_9] : memref<128x128xbf16, #tpu.memory_space<vmem>>, vector<128x128xbf16>
    %cst_10 = arith.constant dense<0.000000e+00> : vector<16x128xf32>
    %12 = tpu.matmul %10, %11, %cst_10 {dimension_numbers = #tpu.dot_dimension_numbers<[1], [0], [0], [1], [0, 0, 1, 1], [], []>} : vector<16x128xbf16>, vector<128x128xbf16>, vector<16x128xf32> -> vector<16x128xf32>
    %13 = vector.broadcast %1 : vector<1x128xf32> to vector<16x128xf32>
    %14 = arith.addf %12, %13 : vector<16x128xf32>
    %cst_11 = arith.constant dense<0xFF800000> : vector<16xf32>
    %15 = vector.multi_reduction <maximumf>, %14, %cst_11 [1] : vector<16x128xf32> to vector<16xf32>
    %16 = vector.shape_cast %15 : vector<16xf32> to vector<16x1xf32>
    %17 = vector.broadcast %16 : vector<16x1xf32> to vector<16x128xf32>
    %18 = arith.subf %14, %17 : vector<16x128xf32>
    %19 = math.exp %18 : vector<16x128xf32>
    %cst_12 = arith.constant dense<0.000000e+00> : vector<16xf32>
    %20 = vector.multi_reduction <add>, %19, %cst_12 [1] : vector<16x128xf32> to vector<16xf32>
    %21 = vector.shape_cast %20 : vector<16xf32> to vector<16x1xf32>
    %22 = vector.broadcast %21 : vector<16x1xf32> to vector<16x128xf32>
    %23 = arith.divf %19, %22 : vector<16x128xf32>
    %c0_13 = arith.constant 0 : index
    %c0_14 = arith.constant 0 : index
    %24 = vector.load %arg6[%c0_13, %c0_14] : memref<16x128xf32, #tpu.memory_space<vmem>>, vector<16x128xf32>
    tpu.vector_store %arg6[%c0_13, %c0_14], %23 {strides = array<i32>} : memref<16x128xf32, #tpu.memory_space<vmem>>, vector<16x128xf32>,
    return
  }
  func.func @transform_0(%arg0: i32) -> (i32, i32) {
    %c0_i32 = arith.constant 0 : i32
    %c0_i32_0 = arith.constant 0 : i32
    return %arg0, %c0_i32 : i32, i32
  }
  func.func @transform_1(%arg0: i32) -> (i32, i32) {
    %c0_i32 = arith.constant 0 : i32
    %c0_i32_0 = arith.constant 0 : i32
    %c0_i32_1 = arith.constant 0 : i32
    return %c0_i32, %c0_i32_0 : i32, i32
  }
  func.func @transform_2(%arg0: i32) -> (i32, i32) {
    %c0_i32 = arith.constant 0 : i32
    %c0_i32_0 = arith.constant 0 : i32
    %c0_i32_1 = arith.constant 0 : i32
    return %c0_i32, %c0_i32_0 : i32, i32
  }
  func.func @transform_3(%arg0: i32) -> (i32, i32) {
    %c0_i32 = arith.constant 0 : i32
    %c0_i32_0 = arith.constant 0 : i32
    %c0_i32_1 = arith.constant 0 : i32
    return %c0_i32, %c0_i32_0 : i32, i32
  }
  func.func @transform_4(%arg0: i32) -> (i32, i32) {
    %c0_i32 = arith.constant 0 : i32
    %c0_i32_0 = arith.constant 0 : i32
    %c0_i32_1 = arith.constant 0 : i32
    return %c0_i32, %c0_i32_0 : i32, i32
  }
  func.func @transform_5(%arg0: i32) -> (i32, i32) {
    %c0_i32 = arith.constant 0 : i32
    %c0_i32_0 = arith.constant 0 : i32
    return %arg0, %c0_i32 : i32, i32
  }
}

module attributes {stable_mosaic.version = 11 : i64} {
  func.func @_policy_kernel(%arg0: i32, %arg1: memref<16x16xf32, #tpu.memory_space<vmem>>, %arg2: memref<16x128xbf16, #tpu.memory_space<vmem>>, %arg3: memref<1x128xf32, #tpu.memory_space<vmem>>, %arg4: memref<128x128xbf16, #tpu.memory_space<vmem>>, %arg5: memref<1x128xf32, #tpu.memory_space<vmem>>, %arg6: memref<16x128xf32, #tpu.memory_space<vmem>>) attributes {dimension_semantics = [#tpu.dimension_semantics<parallel>], iteration_bounds = array<i64: 1>, scalar_prefetch = 0 : i64, scratch_operands = 0 : i64, tpu.core_type = #tpu.core_type<tc>, window_params = [{transform_indices = @transform_0, window_bounds = array<i64: 16, 16>}, {pipeline_mode = #tpu.pipeline_mode<synchronous>, transform_indices = @transform_1, window_bounds = array<i64: 16, 128>}, {pipeline_mode = #tpu.pipeline_mode<synchronous>, transform_indices = @transform_2, window_bounds = array<i64: 1, 128>}, {pipeline_mode = #tpu.pipeline_mode<synchronous>, transform_indices = @transform_3, window_bounds = array<i64: 128, 128>}, {pipeline_mode = #tpu.pipeline_mode<synchronous>, transform_indices = @transform_4, window_bounds = array<i64: 1, 128>}, {transform_indices = @transform_5, window_bounds = array<i64: 16, 128>}]} {
    %c0 = arith.constant 0 : index
    %c0_0 = arith.constant 0 : index
    %0 = vector.load %arg3[%c0, %c0_0] : memref<1x128xf32, #tpu.memory_space<vmem>>, vector<1x128xf32>
    %c0_1 = arith.constant 0 : index
    %c0_2 = arith.constant 0 : index
    %1 = vector.load %arg5[%c0_1, %c0_2] : memref<1x128xf32, #tpu.memory_space<vmem>>, vector<1x128xf32>
    %c0_3 = arith.constant 0 : index
    %c0_4 = arith.constant 0 : index
    %2 = vector.load %arg1[%c0_3, %c0_4] : memref<16x16xf32, #tpu.memory_space<vmem>>, vector<16x16xf32>
    %3 = arith.truncf %2 : vector<16x16xf32> to vector<16x16xbf16>
    %c0_5 = arith.constant 0 : index
    %c0_6 = arith.constant 0 : index
    %4 = vector.load %arg2[%c0_5, %c0_6] : memref<16x128xbf16, #tpu.memory_space<vmem>>, vector<16x128xbf16>
    %cst = arith.constant dense<0.000000e+00> : vector<16x128xf32>
    %5 = tpu.matmul %3, %4, %cst {dimension_numbers = #tpu.dot_dimension_numbers<[1], [0], [0], [1], [0, 0, 1, 1], [], []>} : vector<16x16xbf16>, vector<16x128xbf16>, vector<16x128xf32> -> vector<16x128xf32>
    %6 = vector.broadcast %0 : vector<1x128xf32> to vector<16x128xf32>
    %7 = arith.addf %5, %6 : vector<16x128xf32>
    %cst_7 = arith.constant 0.000000e+00 : f32
    %8 = vector.broadcast %cst_7 : f32 to vector<16x128xf32>
    %9 = arith.maximumf %7, %8 : vector<16x128xf32>
    %10 = arith.truncf %9 : vector<16x128xf32> to vector<16x128xbf16>
    %c0_8 = arith.constant 0 : index
    %c0_9 = arith.constant 0 : index
    %11 = vector.load %arg4[%c0_8, %c0_9] : memref<128x128xbf16, #tpu.memory_space<vmem>>, vector<128x128xbf16>
    %cst_10 = arith.constant dense<0.000000e+00> : vector<16x128xf32>
    %12 = tpu.matmul %10, %11, %cst_10 {dimension_numbers = #tpu.dot_dimension_numbers<[1], [0], [0], [1], [0, 0, 1, 1], [], []>} : vector<16x128xbf16>, vector<128x128xbf16>, vector<16x128xf32> -> vector<16x128xf32>
    %13 = vector.broadcast %1 : vector<1x128xf32> to vector<16x128xf32>
    %14 = arith.addf %12, %13 : vector<16x128xf32>
    %cst_11 = arith.constant dense<0xFF800000> : vector<16xf32>
    %15 = vector.multi_reduction <maximumf>, %14, %cst_11 [1] : vector<16x128xf32> to vector<16xf32>
    %16 = vector.shape_cast %15 : vector<16xf32> to vector<16x1xf32>
    %17 = vector.broadcast %16 : vector<16x1xf32> to vector<16x128xf32>
    %18 = arith.subf %14, %17 : vector<16x128xf32>
    %19 = math.exp %18 : vector<16x128xf32>
    %cst_12 = arith.constant dense<0.000000e+00> : vector<16xf32>
    %20 = vector.multi_reduction <add>, %19, %cst_12 [1] : vector<16x128xf32> to vector<16xf32>
    %21 = vector.shape_cast %20 : vector<16xf32> to vector<16x1xf32>
    %22 = vector.broadcast %21 : vector<16x1xf32> to vector<16x128xf32>
    %23 = arith.divf %19, %22 : vector<16x128xf32>
    %c0_13 = arith.constant 0 : index
    %c0_14 = arith.constant 0 : index
    %24 = vector.load %arg6[%c0_13, %c0_14] : memref<16x128xf32, #tpu.memory_space<vmem>>, vector<16x128xf32>
    tpu.vector_store %arg6[%c0_13, %c0_14], %23 {strides = array<i32>} : memref<16x128xf32, #tpu.memory_space<vmem>>, vector<16x128xf32>,
    return
  }
  func.func @transform_0(%arg0: i32) -> (i32, i32) {
    %c0_i32 = arith.constant 0 : i32
    %c0_i32_0 = arith.constant 0 : i32
    return %arg0, %c0_i32 : i32, i32
  }
  func.func @transform_1(%arg0: i32) -> (i32, i32) {
    %c0_i32 = arith.constant 0 : i32
    %c0_i32_0 = arith.constant 0 : i32
    %c0_i32_1 = arith.constant 0 : i32
    return %c0_i32, %c0_i32_0 : i32, i32
  }
  func.func @transform_2(%arg0: i32) -> (i32, i32) {
    %c0_i32 = arith.constant 0 : i32
    %c0_i32_0 = arith.constant 0 : i32
    %c0_i32_1 = arith.constant 0 : i32
    return %c0_i32, %c0_i32_0 : i32, i32
  }
  func.func @transform_3(%arg0: i32) -> (i32, i32) {
    %c0_i32 = arith.constant 0 : i32
    %c0_i32_0 = arith.constant 0 : i32
    %c0_i32_1 = arith.constant 0 : i32
    return %c0_i32, %c0_i32_0 : i32, i32
  }
  func.func @transform_4(%arg0: i32) -> (i32, i32) {
    %c0_i32 = arith.constant 0 : i32
    %c0_i32_0 = arith.constant 0 : i32
    %c0_i32_1 = arith.constant 0 : i32
    return %c0_i32, %c0_i32_0 : i32, i32
  }
  func.func @transform_5(%arg0: i32) -> (i32, i32) {
    %c0_i32 = arith.constant 0 : i32
    %c0_i32_0 = arith.constant 0 : i32
    return %arg0, %c0_i32 : i32, i32
  }
}

</mosaic_0001>

<bundles_post_ra>
// kernel: tpu_custom_call.1
= control target key start
LH: loop header
LB: loop body
LE: loop exit
PB: predicated region body
PF: predicated region fallthrough
CT: control target
= control target key end

     0   :  { %10 = vsyncpa [#allocation3], 0  ;;  %s505_s0 = inlined_call_operand.hbm [shape: f32[16,16], index: 0, kind: input, shape index: {}]   ;;  %s506_s1 = inlined_call_operand.hbm [shape: bf16[16,128], index: 1, kind: input, shape index: {}]   ;;  %s507_s2 = inlined_call_operand.vmem [shape: f32[1,128], index: 2, kind: input, shape index: {}]   ;;  %s508_s3 = inlined_call_operand.hbm [shape: bf16[128,128], index: 3, kind: input, shape index: {}]   ;;  %s509_s4 = inlined_call_operand.vmem [shape: f32[1,128], index: 4, kind: input, shape index: {}]   ;;  %s510_s5 = inlined_call_operand.hbm [shape: f32[16,128], index: 5, kind: output, shape index: {}]  }
   0x1   :  { %11 = vsyncpa [#allocation6], 0 }
   0x2   :  { %12 = vsyncpa [#allocation4], 0  ;;  %s441_s18 = smov [#allocation5]  }
   0x3   :  { %s30_s19 = sshll.u32 %s441_s18, 4  ;;  %s31_s19 = int_to_ptr.vmem [resolvable:$true] %s30_s19 }
   0x4   :  { %s363_s20 = scalar_lea.vmem %s31_s19, 128  ;;  %p368_p1 = scmp.lt.s32.totalorder %s31_s19, %s31_s19 }
   0x5   :  { %p364_p0 = scmp.ne.s32.totalorder %s31_s19, %s363_s20  ;;  %p369_p2 = scmp.lt.s32.totalorder %s363_s20, %s363_s20 }
   0x7   :  { %p370_p3 = por %p369_p2, %p368_p1 }
   0x9   :  { %p371_p4 = pnand %p370_p3, %p364_p0 }
   0xb   :  { %374 = shalt.err (!%p371_p4)
}
   0xc   :  { %s442_s21 = smov 64   ;;  %s443_s22 = smov 4  }
   0xd   :  { %36 = dma.hbm_to_vmem [thread:$0]  %s506_s1, 128, %s31_s19, [#allocation6], %s442_s21, %s442_s21, %s443_s22  }
   0xe   :  { %s444_s25 = smov [#allocation2]  }
   0xf   :  { %s18_s26 = sshll.u32 %s444_s25, 4  ;;  %s19_s26 = int_to_ptr.vmem [resolvable:$true] %s18_s26 }
  0x10   :  { %s383_s27 = scalar_lea.vmem %s19_s26, 256  ;;  %p388_p6 = scmp.lt.s32.totalorder %s19_s26, %s19_s26 }
  0x11   :  { %p384_p5 = scmp.ne.s32.totalorder %s19_s26, %s383_s27  ;;  %p389_p7 = scmp.lt.s32.totalorder %s383_s27, %s383_s27 }
  0x13   :  { %p390_p8 = por %p389_p7, %p388_p6 }
  0x15   :  { %p391_p9 = pnand %p390_p8, %p384_p5 }
  0x17   :  { %394 = shalt.err (!%p391_p9)
}
  0x18   :  { %s445_s28 = smov 128   ;;  %s446_s29 = smov 8  }
  0x19   :  { %24 = dma.hbm_to_vmem [thread:$0]  %s505_s0, 256, %s19_s26, [#allocation3], %s445_s28, %s445_s28, %s446_s29  }
  0x1a   :  { %s447_s1 = smov [#allocation7]  }
  0x1b   :  { %s44_s7 = sshll.u32 %s447_s1, 4  ;;  %s45_s7 = int_to_ptr.vmem [resolvable:$true] %s44_s7 }
  0x1c   :  { %s403_s8 = scalar_lea.vmem %s45_s7, 1024  ;;  %p408_p11 = scmp.lt.s32.totalorder %s45_s7, %s45_s7 }
  0x1d   :  { %p404_p10 = scmp.ne.s32.totalorder %s45_s7, %s403_s8  ;;  %p409_p12 = scmp.lt.s32.totalorder %s403_s8, %s403_s8 }
  0x1f   :  { %p410_p13 = por %p409_p12, %p408_p11 }
  0x21   :  { %p411_p0 = pnand %p410_p13, %p404_p10 }
  0x23   :  { %414 = shalt.err (!%p411_p0)
}
  0x24   :  { %50 = dma.hbm_to_vmem [thread:$0]  %s508_s3, 1024, %s45_s7, [#allocation6], %s442_s21, %s442_s21, %s443_s22  }
  0x25   :  { %435 = dma.done.wait [#allocation3], 256  }
  0x26   :  { %436 = vsyncadd [#allocation3], 4294967040 }
  0x27   :  { %437 = dma.done.wait [#allocation6], 1152  }
  0x28   :  { %438 = vsyncadd [#allocation6], 4294966144  ;;  %v448_v0 = vmov 0.0   ;;  %vm449_vm0 = vmmov 0   ;;  %v338_v1 = vld [vmem:[#allocation5] sm:$0xff]   ;;  %v65_v2 = vld [vmem:[#allocation2] sm:$0xff] }
  0x29   :  { %302 = vmatprep.subr.bf16.mxu0 %v448_v0  ;;  %304 = vmatprep.mubr.msk.bf16.mxu0 %vm449_vm0, %v448_v0  ;;  %v66_v3 = vld [vmem:[#allocation2 + $0x8] sm:$0xff]  ;;  %vm82_vm1 = vcmask 130048   ;;  %v339_v5 = vld [vmem:[#allocation7 + $0x38] sm:$0xff]   ;;  %v341_v7 = vld [vmem:[#allocation7 + $0x28] sm:$0xff]  }
  0x2a   :  { %308 = vmatprep.subr.bf16.mxu1 %v448_v0  ;;  %324 = vmatprep.mubr.msk.bf16.mxu1 %vm449_vm0, %v448_v0  ;;  %v67_v4 = vpack.c.bf16 %v66_v3, %v65_v2  ;;  %v340_v6 = vld [vmem:[#allocation7 + $0x30] sm:$0xff]   ;;  %v342_v8 = vld [vmem:[#allocation7 + $0x20] sm:$0xff]   ;;  %v343_v9 = vld [vmem:[#allocation7 + $0x18] sm:$0xff]  }
  0x2b   :  { %303 = vmatpush3.bf16.msra.mxu0 %v338_v1  ;;  %309 = vmatpush3.bf16.msra.mxu1 %v339_v5  ;;  %v344_v10 = vld [vmem:[#allocation7 + $0x10] sm:$0xff]   ;;  %v345_v11 = vld [vmem:[#allocation7 + $0x8] sm:$0xff]   ;;  %v346_v12 = vld [vmem:[#allocation7] sm:$0xff]  }
  0x2c   :  { %310 = vmatprep.subr.bf16.mxu1 %v448_v0  ;;  %v279_v13 = vld [vmem:[%s507_s2] ss:$0 sm:$0xff]  ;;  %s450_s2 = smov [#allocation8]  }
  0x2d   :  { %v282_v23 = vld [vmem:[%s509_s4] ss:$0 sm:$0xff]  ;;  %s266_s4 = sshll.u32 %s450_s2, 4  ;;  %s267_s4 = int_to_ptr.vmem [resolvable:$true] %s266_s4 }
  0x2e   :  { %305 = vmatmul.mubr.msk.bf16.vlgmr.msra.gmra.mxu0 %vm82_vm1, %v67_v4  ;;  %s415_s13 = scalar_lea.vmem %s267_s4, 256  ;;  %p420_p2 = scmp.lt.s32.totalorder %s267_s4, %s267_s4 }
  0x2f   :  { %311 = vmatpush3.bf16.msra.mxu1 %v340_v6  ;;  %p416_p1 = scmp.ne.s32.totalorder %s267_s4, %s415_s13  ;;  %p421_p3 = scmp.lt.s32.totalorder %s415_s13, %s415_s13 }
  0x30   :  { %312 = vmatprep.subr.bf16.mxu1 %v448_v0 }
  0x31   :  { %p422_p4 = por %p421_p3, %p420_p2 }
  0x33   :  { %313 = vmatpush3.bf16.msra.mxu1 %v341_v7  ;;  %p423_p5 = pnand %p422_p4, %p416_p1 }
  0x34   :  { %314 = vmatprep.subr.bf16.mxu1 %v448_v0 }
  0x37   :  { %315 = vmatpush3.bf16.msra.mxu1 %v342_v8 }
  0x38   :  { %316 = vmatprep.subr.bf16.mxu1 %v448_v0 }
  0x3b   :  { %317 = vmatpush3.bf16.msra.mxu1 %v343_v9 }
  0x3c   :  { %318 = vmatprep.subr.bf16.mxu1 %v448_v0 }
  0x3f   :  { %319 = vmatpush3.bf16.msra.mxu1 %v344_v10 }
  0x40   :  { %320 = vmatprep.subr.bf16.mxu1 %v448_v0 }
  0x43   :  { %321 = vmatpush3.bf16.msra.mxu1 %v345_v11 }
  0x44   :  { %322 = vmatprep.subr.bf16.mxu1 %v448_v0 }
  0x47   :  { %323 = vmatpush3.bf16.msra.mxu1 %v346_v12 }
  0xee   :  { %v120_v14 = vpop.f32.mrf.mxu0 }
  0xef   :  { %v121_v16 = vadd.f32 %v279_v13, %v120_v14 }
  0xf0   :  { %v306_v15 = vpop.f32.mrf.mxu0 }
  0xf1   :  { %v127_v20 = vmax.f32 %v121_v16, 0.0 }
  0xf2   :  { %v123_v17 = vpop.f32.mrf.mxu0 }
  0xf3   :  { %v124_v18 = vadd.f32 %v279_v13, %v123_v17 }
  0xf4   :  { %v307_v19 = vpop.f32.mrf.mxu0 }
  0xf5   :  { %v128_v21 = vmax.f32 %v124_v18, 0.0 }
  0xf7   :  { %v129_v22 = vpack.c.bf16 %v128_v21, %v127_v20 }
  0xf9   :  { %325 = vmatmul.mubr.bf16.vlgmr.msra.gmra.mxu1 %v129_v22 }
 0x1b9   :  { %v234_v24 = vpop.f32.mrf.mxu1 }
 0x1ba   :  { %v235_v25 = vadd.f32 %v282_v23, %v234_v24 }
 0x1bb   :  { %v326_v26 = vpop.f32.mrf.mxu1 }
 0x1bc   :  { %241 = vmax.xlane.f32.xlu0 %v235_v25 }
 0x1bd   :  { %v237_v27 = vpop.f32.mrf.mxu1 }
 0x1be   :  { %v238_v28 = vadd.f32 %v282_v23, %v237_v27 }
 0x1bf   :  { %v327_v29 = vpop.f32.mrf.mxu1 }
 0x1c0   :  { %243 = vmax.xlane.f32.xlu0 %v238_v28 }
 0x245   :  { %v242_v30 = vpop.xlane.xlu0 %241 }
 0x246   :  { %v245_v31 = vsub.f32 %v235_v25, %v242_v30 }
 0x248   :  { %v247_v32 = vmul.f32 1.442695, %v245_v31 }
 0x249   :  { %v244_v33 = vpop.xlane.xlu0 %243 }
 0x24a   :  { %347 = vpow2.f32 %v247_v32  ;;  %v246_v34 = vsub.f32 %v238_v28, %v244_v33 }
 0x24c   :  { %v249_v35 = vmul.f32 1.442695, %v246_v34 }
 0x24e   :  { %349 = vpow2.f32 %v249_v35 }
 0x257   :  { %v348_v36 = vpop.eup %347 }
 0x258   :  { %251 = vadd.xlane.f32.xlu1 %v348_v36 }
 0x25b   :  { %v350_v37 = vpop.eup %349 }
 0x25c   :  { %253 = vadd.xlane.f32.xlu1 %v350_v37 }
 0x2e1   :  { %v252_v38 = vpop.xlane.xlu1 %251 }
 0x2e2   :  { %351 = vrcp.f32 %v252_v38 }
 0x2e5   :  { %v254_v39 = vpop.xlane.xlu1 %253 }
 0x2e6   :  { %353 = vrcp.f32 %v254_v39 }
 0x2ef   :  { %v352_v40 = vpop.eup %351 }
 0x2f0   :  { %v256_v41 = vmul.f32 %v352_v40, %v348_v36 }
 0x2f2   :  { %259 = vst [vmem:[#allocation8] sm:$0xff] %v256_v41 }
 0x2f3   :  { %v354_v42 = vpop.eup %353 }
 0x2f4   :  { %v258_v43 = vmul.f32 %v354_v42, %v350_v37 }
 0x2f6   :  { %260 = vst [vmem:[#allocation8 + $0x8] sm:$0xff] %v258_v43 }
 0x2f7   :  { %426 = shalt.err (!%p423_p5)
}
 0x2f8   :  { %272 = dma.vmem_to_hbm [thread:$0]  %s267_s4, 256, %s510_s5, [#allocation4], %s445_s28, %s445_s28, %s446_s29  }
 0x2f9   :  { %439 = dma.done.wait [#allocation4], 256  }
 0x2fa   :  { %440 = vsyncadd [#allocation4], 4294967040 }
 0x2fb   :  { %276 = vsyncpa [#allocation3], 1 }
 0x2fc   :  { %277 = vsyncpa [#allocation6], 1 }
 0x2fd   :  { %278 = vsyncpa [#allocation4], 1 }

// kernel: tpu_custom_call.1
= control target key start
LH: loop header
LB: loop body
LE: loop exit
PB: predicated region body
PF: predicated region fallthrough
CT: control target
= control target key end

     0   :  { %10 = vsyncpa [#allocation3], 0  ;;  %s505_s0 = inlined_call_operand.hbm [shape: f32[16,16], index: 0, kind: input, shape index: {}]   ;;  %s506_s1 = inlined_call_operand.hbm [shape: bf16[16,128], index: 1, kind: input, shape index: {}]   ;;  %s507_s2 = inlined_call_operand.vmem [shape: f32[1,128], index: 2, kind: input, shape index: {}]   ;;  %s508_s3 = inlined_call_operand.hbm [shape: bf16[128,128], index: 3, kind: input, shape index: {}]   ;;  %s509_s4 = inlined_call_operand.vmem [shape: f32[1,128], index: 4, kind: input, shape index: {}]   ;;  %s510_s5 = inlined_call_operand.hbm [shape: f32[16,128], index: 5, kind: output, shape index: {}]  }
   0x1   :  { %11 = vsyncpa [#allocation6], 0 }
   0x2   :  { %12 = vsyncpa [#allocation4], 0  ;;  %s441_s18 = smov [#allocation5]  }
   0x3   :  { %s30_s19 = sshll.u32 %s441_s18, 4  ;;  %s31_s19 = int_to_ptr.vmem [resolvable:$true] %s30_s19 }
   0x4   :  { %s363_s20 = scalar_lea.vmem %s31_s19, 128  ;;  %p368_p1 = scmp.lt.s32.totalorder %s31_s19, %s31_s19 }
   0x5   :  { %p364_p0 = scmp.ne.s32.totalorder %s31_s19, %s363_s20  ;;  %p369_p2 = scmp.lt.s32.totalorder %s363_s20, %s363_s20 }
   0x7   :  { %p370_p3 = por %p369_p2, %p368_p1 }
   0x9   :  { %p371_p4 = pnand %p370_p3, %p364_p0 }
   0xb   :  { %374 = shalt.err (!%p371_p4)
}
   0xc   :  { %s442_s21 = smov 64   ;;  %s443_s22 = smov 4  }
   0xd   :  { %36 = dma.hbm_to_vmem [thread:$0]  %s506_s1, 128, %s31_s19, [#allocation6], %s442_s21, %s442_s21, %s443_s22  }
   0xe   :  { %s444_s25 = smov [#allocation2]  }
   0xf   :  { %s18_s26 = sshll.u32 %s444_s25, 4  ;;  %s19_s26 = int_to_ptr.vmem [resolvable:$true] %s18_s26 }
  0x10   :  { %s383_s27 = scalar_lea.vmem %s19_s26, 256  ;;  %p388_p6 = scmp.lt.s32.totalorder %s19_s26, %s19_s26 }
  0x11   :  { %p384_p5 = scmp.ne.s32.totalorder %s19_s26, %s383_s27  ;;  %p389_p7 = scmp.lt.s32.totalorder %s383_s27, %s383_s27 }
  0x13   :  { %p390_p8 = por %p389_p7, %p388_p6 }
  0x15   :  { %p391_p9 = pnand %p390_p8, %p384_p5 }
  0x17   :  { %394 = shalt.err (!%p391_p9)
}
  0x18   :  { %s445_s28 = smov 128   ;;  %s446_s29 = smov 8  }
  0x19   :  { %24 = dma.hbm_to_vmem [thread:$0]  %s505_s0, 256, %s19_s26, [#allocation3], %s445_s28, %s445_s28, %s446_s29  }
  0x1a   :  { %s447_s1 = smov [#allocation7]  }
  0x1b   :  { %s44_s7 = sshll.u32 %s447_s1, 4  ;;  %s45_s7 = int_to_ptr.vmem [resolvable:$true] %s44_s7 }
  0x1c   :  { %s403_s8 = scalar_lea.vmem %s45_s7, 1024  ;;  %p408_p11 = scmp.lt.s32.totalorder %s45_s7, %s45_s7 }
  0x1d   :  { %p404_p10 = scmp.ne.s32.totalorder %s45_s7, %s403_s8  ;;  %p409_p12 = scmp.lt.s32.totalorder %s403_s8, %s403_s8 }
  0x1f   :  { %p410_p13 = por %p409_p12, %p408_p11 }
  0x21   :  { %p411_p0 = pnand %p410_p13, %p404_p10 }
  0x23   :  { %414 = shalt.err (!%p411_p0)
}
  0x24   :  { %50 = dma.hbm_to_vmem [thread:$0]  %s508_s3, 1024, %s45_s7, [#allocation6], %s442_s21, %s442_s21, %s443_s22  }
  0x25   :  { %435 = dma.done.wait [#allocation3], 256  }
  0x26   :  { %436 = vsyncadd [#allocation3], 4294967040 }
  0x27   :  { %437 = dma.done.wait [#allocation6], 1152  }
  0x28   :  { %438 = vsyncadd [#allocation6], 4294966144  ;;  %v448_v0 = vmov 0.0   ;;  %vm449_vm0 = vmmov 0   ;;  %v338_v1 = vld [vmem:[#allocation5] sm:$0xff]   ;;  %v65_v2 = vld [vmem:[#allocation2] sm:$0xff] }
  0x29   :  { %302 = vmatprep.subr.bf16.mxu0 %v448_v0  ;;  %304 = vmatprep.mubr.msk.bf16.mxu0 %vm449_vm0, %v448_v0  ;;  %v66_v3 = vld [vmem:[#allocation2 + $0x8] sm:$0xff]  ;;  %vm82_vm1 = vcmask 130048   ;;  %v339_v5 = vld [vmem:[#allocation7 + $0x38] sm:$0xff]   ;;  %v341_v7 = vld [vmem:[#allocation7 + $0x28] sm:$0xff]  }
  0x2a   :  { %308 = vmatprep.subr.bf16.mxu1 %v448_v0  ;;  %324 = vmatprep.mubr.msk.bf16.mxu1 %vm449_vm0, %v448_v0  ;;  %v67_v4 = vpack.c.bf16 %v66_v3, %v65_v2  ;;  %v340_v6 = vld [vmem:[#allocation7 + $0x30] sm:$0xff]   ;;  %v342_v8 = vld [vmem:[#allocation7 + $0x20] sm:$0xff]   ;;  %v343_v9 = vld [vmem:[#allocation7 + $0x18] sm:$0xff]  }
  0x2b   :  { %303 = vmatpush3.bf16.msra.mxu0 %v338_v1  ;;  %309 = vmatpush3.bf16.msra.mxu1 %v339_v5  ;;  %v344_v10 = vld [vmem:[#allocation7 + $0x10] sm:$0xff]   ;;  %v345_v11 = vld [vmem:[#allocation7 + $0x8] sm:$0xff]   ;;  %v346_v12 = vld [vmem:[#allocation7] sm:$0xff]  }
  0x2c   :  { %310 = vmatprep.subr.bf16.mxu1 %v448_v0  ;;  %v279_v13 = vld [vmem:[%s507_s2] ss:$0 sm:$0xff]  ;;  %s450_s2 = smov [#allocation8]  }
  0x2d   :  { %v282_v23 = vld [vmem:[%s509_s4] ss:$0 sm:$0xff]  ;;  %s266_s4 = sshll.u32 %s450_s2, 4  ;;  %s267_s4 = int_to_ptr.vmem [resolvable:$true] %s266_s4 }
  0x2e   :  { %305 = vmatmul.mubr.msk.bf16.vlgmr.msra.gmra.mxu0 %vm82_vm1, %v67_v4  ;;  %s415_s13 = scalar_lea.vmem %s267_s4, 256  ;;  %p420_p2 = scmp.lt.s32.totalorder %s267_s4, %s267_s4 }
  0x2f   :  { %311 = vmatpush3.bf16.msra.mxu1 %v340_v6  ;;  %p416_p1 = scmp.ne.s32.totalorder %s267_s4, %s415_s13  ;;  %p421_p3 = scmp.lt.s32.totalorder %s415_s13, %s415_s13 }
  0x30   :  { %312 = vmatprep.subr.bf16.mxu1 %v448_v0 }
  0x31   :  { %p422_p4 = por %p421_p3, %p420_p2 }
  0x33   :  { %313 = vmatpush3.bf16.msra.mxu1 %v341_v7  ;;  %p423_p5 = pnand %p422_p4, %p416_p1 }
  0x34   :  { %314 = vmatprep.subr.bf16.mxu1 %v448_v0 }
  0x37   :  { %315 = vmatpush3.bf16.msra.mxu1 %v342_v8 }
  0x38   :  { %316 = vmatprep.subr.bf16.mxu1 %v448_v0 }
  0x3b   :  { %317 = vmatpush3.bf16.msra.mxu1 %v343_v9 }
  0x3c   :  { %318 = vmatprep.subr.bf16.mxu1 %v448_v0 }
  0x3f   :  { %319 = vmatpush3.bf16.msra.mxu1 %v344_v10 }
  0x40   :  { %320 = vmatprep.subr.bf16.mxu1 %v448_v0 }
  0x43   :  { %321 = vmatpush3.bf16.msra.mxu1 %v345_v11 }
  0x44   :  { %322 = vmatprep.subr.bf16.mxu1 %v448_v0 }
  0x47   :  { %323 = vmatpush3.bf16.msra.mxu1 %v346_v12 }
  0xee   :  { %v120_v14 = vpop.f32.mrf.mxu0 }
  0xef   :  { %v121_v16 = vadd.f32 %v279_v13, %v120_v14 }
  0xf0   :  { %v306_v15 = vpop.f32.mrf.mxu0 }
  0xf1   :  { %v127_v20 = vmax.f32 %v121_v16, 0.0 }
  0xf2   :  { %v123_v17 = vpop.f32.mrf.mxu0 }
  0xf3   :  { %v124_v18 = vadd.f32 %v279_v13, %v123_v17 }
  0xf4   :  { %v307_v19 = vpop.f32.mrf.mxu0 }
  0xf5   :  { %v128_v21 = vmax.f32 %v124_v18, 0.0 }
  0xf7   :  { %v129_v22 = vpack.c.bf16 %v128_v21, %v127_v20 }
  0xf9   :  { %325 = vmatmul.mubr.bf16.vlgmr.msra.gmra.mxu1 %v129_v22 }
 0x1b9   :  { %v234_v24 = vpop.f32.mrf.mxu1 }
 0x1ba   :  { %v235_v25 = vadd.f32 %v282_v23, %v234_v24 }
 0x1bb   :  { %v326_v26 = vpop.f32.mrf.mxu1 }
 0x1bc   :  { %241 = vmax.xlane.f32.xlu0 %v235_v25 }
 0x1bd   :  { %v237_v27 = vpop.f32.mrf.mxu1 }
 0x1be   :  { %v238_v28 = vadd.f32 %v282_v23, %v237_v27 }
 0x1bf   :  { %v327_v29 = vpop.f32.mrf.mxu1 }
 0x1c0   :  { %243 = vmax.xlane.f32.xlu0 %v238_v28 }
 0x245   :  { %v242_v30 = vpop.xlane.xlu0 %241 }
 0x246   :  { %v245_v31 = vsub.f32 %v235_v25, %v242_v30 }
 0x248   :  { %v247_v32 = vmul.f32 1.442695, %v245_v31 }
 0x249   :  { %v244_v33 = vpop.xlane.xlu0 %243 }
 0x24a   :  { %347 = vpow2.f32 %v247_v32  ;;  %v246_v34 = vsub.f32 %v238_v28, %v244_v33 }
 0x24c   :  { %v249_v35 = vmul.f32 1.442695, %v246_v34 }
 0x24e   :  { %349 = vpow2.f32 %v249_v35 }
 0x257   :  { %v348_v36 = vpop.eup %347 }
 0x258   :  { %251 = vadd.xlane.f32.xlu1 %v348_v36 }
 0x25b   :  { %v350_v37 = vpop.eup %349 }
 0x25c   :  { %253 = vadd.xlane.f32.xlu1 %v350_v37 }
 0x2e1   :  { %v252_v38 = vpop.xlane.xlu1 %251 }
 0x2e2   :  { %351 = vrcp.f32 %v252_v38 }
 0x2e5   :  { %v254_v39 = vpop.xlane.xlu1 %253 }
 0x2e6   :  { %353 = vrcp.f32 %v254_v39 }
 0x2ef   :  { %v352_v40 = vpop.eup %351 }
 0x2f0   :  { %v256_v41 = vmul.f32 %v352_v40, %v348_v36 }
 0x2f2   :  { %259 = vst [vmem:[#allocation8] sm:$0xff] %v256_v41 }
 0x2f3   :  { %v354_v42 = vpop.eup %353 }
 0x2f4   :  { %v258_v43 = vmul.f32 %v354_v42, %v350_v37 }
 0x2f6   :  { %260 = vst [vmem:[#allocation8 + $0x8] sm:$0xff] %v258_v43 }
 0x2f7   :  { %426 = shalt.err (!%p423_p5)
}
 0x2f8   :  { %272 = dma.vmem_to_hbm [thread:$0]  %s267_s4, 256, %s510_s5, [#allocation4], %s445_s28, %s445_s28, %s446_s29  }
 0x2f9   :  { %439 = dma.done.wait [#allocation4], 256  }
 0x2fa   :  { %440 = vsyncadd [#allocation4], 4294967040 }
 0x2fb   :  { %276 = vsyncpa [#allocation3], 1 }
 0x2fc   :  { %277 = vsyncpa [#allocation6], 1 }
 0x2fd   :  { %278 = vsyncpa [#allocation4], 1 }

</bundles_post_ra>
